<compile_context>
chip_gen: v7x
topology: tpu7x:2x2x1
jax: 0.10.0
libtpu: 0.0.40
codegen_flags: <defaults>
</compile_context>

<pallas_src>
import functools

import jax
import jax.numpy as jnp
from jax.experimental import pallas as pl
from jax.experimental.pallas import tpu as pltpu


def _round_up(n, m):
    return (n + m - 1) // m * m


def _device_vmem_bytes():
    """Physical per-TensorCore VMEM; conservative fallback if unavailable."""
    try:
        return int(pltpu.get_tpu_info().vmem_capacity_bytes)
    except Exception:
        return 64 << 20          # assume the smallest budget (v7x per-TC)


def _choose_tm(n_rows, tm_max):
    """Row-tile size: big tiles for MXU occupancy, >= 2 grid steps for v7x
    megacore, multiples of 128 rows (when large enough) for v5e MXU passes."""
    tm_max = max(8, (tm_max // 8) * 8)
    if n_rows <= 8:
        return 8
    if n_rows <= 2 * tm_max:
        half = _round_up(pl.cdiv(n_rows, 2), 8)
        if half >= 128:
            half = _round_up(half, 128)
        return max(8, min(tm_max, half))
    return tm_max


def _final_layer_kernel(x_ref, c_ref, w_shift_ref, w_scale_ref,
                        b_shift_ref, b_scale_ref, w_lin_ref, b_lin_ref,
                        o_ref, *, approx_silu):
    # x_ref, c_ref:      (TM, D)   token-row tiles
    # w_shift/w_scale:   (D, D)    adaLN weight halves (grid-invariant, VMEM)
    # b_shift/b_scale:   (1, D)    adaLN bias halves (f32)
    # w_lin:             (D, Ap)   output projection, lane-padded to 128
    # b_lin:             (1, Ap)
    # o_ref:             (TM, Ap)
    compute_dtype = w_shift_ref.dtype
    x = x_ref[...].astype(jnp.float32)
    c = c_ref[...].astype(jnp.float32)

    # SiLU(c) = c * sigmoid(c) = c / (1 + exp(-c)).
    # exp() runs on the EUP; the approx reciprocal also uses the EUP slot and
    # is only used on the reduced-precision fast path.  Kept in f32 for
    # portability (v5e has no bf16 VPU/EUP).
    denom = 1.0 + jnp.exp(-c)
    if approx_silu:
        silu_c = c * pl.reciprocal(denom, approx=True)
    else:
        silu_c = c / denom                       # exact path (f32 reference)
    silu_c = silu_c.astype(compute_dtype)

    # adaLN_modulation -> shift, scale   (MXU, f32 accumulation)
    shift = jnp.dot(silu_c, w_shift_ref[...],
                    preferred_element_type=jnp.float32) + b_shift_ref[...]
    scale = jnp.dot(silu_c, w_scale_ref[...],
                    preferred_element_type=jnp.float32) + b_scale_ref[...]

    # LayerNorm (no affine, eps=1e-6) in f32 -- strictly per-row, so garbage
    # rows in a ragged last tile cannot contaminate valid rows.
    mean = jnp.mean(x, axis=-1, keepdims=True)
    var = jnp.mean(jnp.square(x - mean), axis=-1, keepdims=True)
    x_norm = (x - mean) * jax.lax.rsqrt(var + 1e-6)

    # modulate: x_norm * (1 + scale) + shift
    h = (x_norm * (1.0 + scale) + shift).astype(compute_dtype)

    # final linear: (TM, D) @ (D, Ap) + b   (MXU, f32 accumulation)
    out = jnp.dot(h, w_lin_ref[...],
                  preferred_element_type=jnp.float32) + b_lin_ref[...]
    o_ref[...] = out.astype(o_ref.dtype)


def prepare_params(w_ada, b_ada, w_lin, b_lin, *, compute_dtype=jnp.bfloat16):
    """One-time weight prep (call once at setup, NOT per forward call).

    w_ada: (D, 2D), b_ada: (2D,), w_lin: (D, A), b_lin: (A,) -- weights in
    (in, out) layout, i.e. transposed relative to PyTorch's (out, in).

    Splits the adaLN weight into shift/scale halves (no in-kernel lane slicing
    at a non-128 boundary), casts to the MXU compute dtype, and zero-pads the
    output projection to a lane-dense (multiple-of-128) width.
    """
    D = w_ada.shape[0]
    A = w_lin.shape[1]
    A_pad = _round_up(A, 128)

    w_shift = w_ada[:, :D].astype(compute_dtype)
    w_scale = w_ada[:, D:].astype(compute_dtype)
    b_shift = b_ada[:D].reshape(1, D).astype(jnp.float32)
    b_scale = b_ada[D:].reshape(1, D).astype(jnp.float32)

    w_lin_p = jnp.zeros((D, A_pad), compute_dtype).at[:, :A].set(
        w_lin.astype(compute_dtype))
    b_lin_p = jnp.zeros((1, A_pad), jnp.float32).at[0, :A].set(
        b_lin.astype(jnp.float32))
    return (w_shift, w_scale, b_shift, b_scale, w_lin_p, b_lin_p)


@functools.partial(jax.jit, static_argnames=("action_dim", "tm_max"))
def final_layer(x, c, w_shift, w_scale, b_shift, b_scale, w_lin_p, b_lin_p,
                *, action_dim, tm_max=None):
    """x: (B, S, D), c: (B, S, D) -> (B, S, action_dim).

    Weight arrays must come from prepare_params() (one-time prep)."""
    B, S, D = x.shape
    A_pad = w_lin_p.shape[1]
    N = B * S

    vmem_cap = _device_vmem_bytes()
    if tm_max is None:
        # 512-row tiles on 128-MiB parts (v5e/v6e); 256 on 64-MiB parts (v7x).
        tm_max = 512 if vmem_cap > (64 << 20) else 256
    tm = _choose_tm(N, tm_max)
    grid = pl.cdiv(N, tm)       # ragged last block handled by Pallas (no pad)

    x2 = x.reshape(N, D)
    c2 = c.reshape(N, D)

    # TODO(synk): for very large D on 64-MiB-VMEM parts (v7x, D >= ~3k) the
    # resident full-D weights no longer fit; switch to K-tiled matmuls over D
    # with pltpu.emit_pipeline + VMEM accumulators in that regime.

    def _resident(shape):
        # Grid-invariant operand: single VMEM copy, no pointless double buffer.
        return pl.BlockSpec(shape, lambda *_: (0,) * len(shape),
                            pipeline_mode=pl.Buffered(buffer_count=1))

    # Explicit VMEM budget with headroom below physical capacity.
    in_itm = x.dtype.itemsize + c.dtype.itemsize
    w_itm = w_shift.dtype.itemsize
    tile_in = tm * D * in_itm                               # one x+c buffer set
    tile_out = tm * A_pad * x.dtype.itemsize                # one output buffer
    weight_b = (2 * D * D + D * A_pad) * w_itm + (2 * D + A_pad) * 4
    temps = 8 * tm * D * 4                                  # f32 intermediates
    needed = 2 * tile_in + 2 * tile_out + weight_b + temps
    vmem_limit = int(min(int(vmem_cap * 0.78),              # headroom (v7x!)
                         max(32 << 20, 2 * needed)))

    approx_silu = w_shift.dtype != jnp.float32   # exact SiLU on the f32 path

    out2 = pl.pallas_call(
        functools.partial(_final_layer_kernel, approx_silu=approx_silu),
        out_shape=jax.ShapeDtypeStruct((N, A_pad), x.dtype),
        grid_spec=pltpu.PrefetchScalarGridSpec(
            num_scalar_prefetch=0,
            grid=(grid,),
            in_specs=[
                pl.BlockSpec((tm, D), lambda i: (i, 0)),    # x rows
                pl.BlockSpec((tm, D), lambda i: (i, 0)),    # c rows
                _resident((D, D)),                          # w_shift
                _resident((D, D)),                          # w_scale
                _resident((1, D)),                          # b_shift
                _resident((1, D)),                          # b_scale
                _resident((D, A_pad)),                      # w_lin (padded)
                _resident((1, A_pad)),                      # b_lin (padded)
            ],
            out_specs=pl.BlockSpec((tm, A_pad), lambda i: (i, 0)),
        ),
        compiler_params=pltpu.CompilerParams(
            dimension_semantics=("parallel",),              # megacore on v7x
            vmem_limit_bytes=vmem_limit),
    )(x2, c2, w_shift, w_scale, b_shift, b_scale, w_lin_p, b_lin_p)

    return out2[:, :action_dim].reshape(B, S, action_dim)


def _orthogonal(key, shape, gain):
    # deterministic orthogonal init (same scheme as nn.init.orthogonal_)
    rows, cols = shape
    n = max(rows, cols)
    a = jax.random.normal(key, (n, n), dtype=jnp.float32)
    q, r = jnp.linalg.qr(a)
    q = q * jnp.sign(jnp.diag(r))[None, :]
    return gain * q[:rows, :cols]


def make_params(key, model_dim, action_dim):
    k1, k2 = jax.random.split(key)
    gain = 2.0 ** 0.5  # nn.init.calculate_gain('relu')
    # PyTorch stores Linear weight as (out, in); we pass transposed (in, out).
    w_lin_pt = _orthogonal(k1, (action_dim, model_dim), gain)       # (A, D)
    w_ada_pt = _orthogonal(k2, (2 * model_dim, model_dim), gain)    # (2D, D)
    b_lin = jnp.zeros((action_dim,), jnp.float32)
    b_ada = jnp.zeros((2 * model_dim,), jnp.float32)
    return w_ada_pt.T, b_ada, w_lin_pt.T, b_lin


def reference(x, c, w_ada, b_ada, w_lin, b_lin):
    d = x.shape[-1]
    hp = jax.lax.Precision.HIGHEST
    mod = jnp.dot(jax.nn.silu(c), w_ada, precision=hp) + b_ada
    shift, scale = mod[..., :d], mod[..., d:]
    mean = jnp.mean(x, axis=-1, keepdims=True)
    var = jnp.mean(jnp.square(x - mean), axis=-1, keepdims=True)
    xn = (x - mean) * jax.lax.rsqrt(var + 1e-6)
    h = xn * (1.0 + scale) + shift
    return jnp.dot(h, w_lin, precision=hp) + b_lin


if __name__ == "__main__":
    B, S, D, A = 2, 8, 32, 16
    key = jax.random.PRNGKey(0)
    kx, kc, kp = jax.random.split(key, 3)

    x = jax.random.normal(kx, (B, S, D), dtype=jnp.float32)
    c = jax.random.normal(kc, (B, S, D), dtype=jnp.float32)
    w_ada, b_ada, w_lin, b_lin = make_params(kp, D, A)

    ref = reference(x, c, w_ada, b_ada, w_lin, b_lin)

    # Fast path: bf16 MXU operands + f32 accumulation (loose bf16 tolerance).
    params_bf16 = prepare_params(w_ada, b_ada, w_lin, b_lin,
                                 compute_dtype=jnp.bfloat16)
    out = jax.block_until_ready(final_layer(x, c, *params_bf16, action_dim=A))
    assert out.shape == (B, S, A)
    assert jnp.allclose(out, ref, atol=1e-1, rtol=1e-1)

    # Strict kernel-logic check: full-f32 compute, exact SiLU (no approx
    # reciprocal).  Tolerance leaves margin for MXU f32 pass-policy deltas.
    params_f32 = prepare_params(w_ada, b_ada, w_lin, b_lin,
                                compute_dtype=jnp.float32)
    out_f32 = jax.block_until_ready(
        final_layer(x, c, *params_f32, action_dim=A))
    assert jnp.allclose(out_f32, ref, atol=1e-2, rtol=1e-2)

    print("KERNEL_OK")
</pallas_src>

<mosaic_0001>
module attributes {stable_mosaic.version = 11 : i64} {
  func.func @_final_layer_kernel(%arg0: i32, %arg1: memref<8x32xf32, #tpu.memory_space<vmem>>, %arg2: memref<8x32xf32, #tpu.memory_space<vmem>>, %arg3: memref<32x32xbf16, #tpu.memory_space<vmem>>, %arg4: memref<32x32xbf16, #tpu.memory_space<vmem>>, %arg5: memref<1x32xf32, #tpu.memory_space<vmem>>, %arg6: memref<1x32xf32, #tpu.memory_space<vmem>>, %arg7: memref<32x128xbf16, #tpu.memory_space<vmem>>, %arg8: memref<1x128xf32, #tpu.memory_space<vmem>>, %arg9: memref<8x128xf32, #tpu.memory_space<vmem>>) attributes {dimension_semantics = [#tpu.dimension_semantics<parallel>], iteration_bounds = array<i64: 2>, scalar_prefetch = 0 : i64, scratch_operands = 0 : i64, tpu.core_type = #tpu.core_type<tc>, window_params = [{transform_indices = @transform_0, window_bounds = array<i64: 8, 32>}, {transform_indices = @transform_1, window_bounds = array<i64: 8, 32>}, {pipeline_mode = #tpu.pipeline_mode<synchronous>, transform_indices = @transform_2, window_bounds = array<i64: 32, 32>}, {pipeline_mode = #tpu.pipeline_mode<synchronous>, transform_indices = @transform_3, window_bounds = array<i64: 32, 32>}, {pipeline_mode = #tpu.pipeline_mode<synchronous>, transform_indices = @transform_4, window_bounds = array<i64: 1, 32>}, {pipeline_mode = #tpu.pipeline_mode<synchronous>, transform_indices = @transform_5, window_bounds = array<i64: 1, 32>}, {pipeline_mode = #tpu.pipeline_mode<synchronous>, transform_indices = @transform_6, window_bounds = array<i64: 32, 128>}, {pipeline_mode = #tpu.pipeline_mode<synchronous>, transform_indices = @transform_7, window_bounds = array<i64: 1, 128>}, {transform_indices = @transform_8, window_bounds = array<i64: 8, 128>}]} {
    %c0 = arith.constant 0 : index
    %c0_0 = arith.constant 0 : index
    %0 = vector.load %arg1[%c0, %c0_0] : memref<8x32xf32, #tpu.memory_space<vmem>>, vector<8x32xf32>
    %c0_1 = arith.constant 0 : index
    %c0_2 = arith.constant 0 : index
    %1 = vector.load %arg2[%c0_1, %c0_2] : memref<8x32xf32, #tpu.memory_space<vmem>>, vector<8x32xf32>
    %cst = arith.constant 0.000000e+00 : f32
    %2 = vector.broadcast %cst : f32 to vector<8x32xf32>
    %3 = arith.subf %2, %1 : vector<8x32xf32>
    %4 = math.exp %3 : vector<8x32xf32>
    %cst_3 = arith.constant 1.000000e+00 : f32
    %5 = vector.broadcast %cst_3 : f32 to vector<8x32xf32>
    %6 = arith.addf %5, %4 : vector<8x32xf32>
    %7 = tpu.reciprocal %6 {approx = true} : vector<8x32xf32> -> vector<8x32xf32>
    %8 = arith.mulf %1, %7 : vector<8x32xf32>
    %9 = arith.truncf %8 : vector<8x32xf32> to vector<8x32xbf16>
    %c0_4 = arith.constant 0 : index
    %c0_5 = arith.constant 0 : index
    %10 = vector.load %arg3[%c0_4, %c0_5] : memref<32x32xbf16, #tpu.memory_space<vmem>>, vector<32x32xbf16>
    %cst_6 = arith.constant dense<0.000000e+00> : vector<8x32xf32>
    %11 = tpu.matmul %9, %10, %cst_6 {dimension_numbers = #tpu.dot_dimension_numbers<[1], [0], [0], [1], [0, 0, 1, 1], [], []>} : vector<8x32xbf16>, vector<32x32xbf16>, vector<8x32xf32> -> vector<8x32xf32>
    %c0_7 = arith.constant 0 : index
    %c0_8 = arith.constant 0 : index
    %12 = vector.load %arg5[%c0_7, %c0_8] : memref<1x32xf32, #tpu.memory_space<vmem>>, vector<1x32xf32>
    %13 = vector.broadcast %12 : vector<1x32xf32> to vector<8x32xf32>
    %14 = arith.addf %11, %13 : vector<8x32xf32>
    %c0_9 = arith.constant 0 : index
    %c0_10 = arith.constant 0 : index
    %15 = vector.load %arg4[%c0_9, %c0_10] : memref<32x32xbf16, #tpu.memory_space<vmem>>, vector<32x32xbf16>
    %cst_11 = arith.constant dense<0.000000e+00> : vector<8x32xf32>
    %16 = tpu.matmul %9, %15, %cst_11 {dimension_numbers = #tpu.dot_dimension_numbers<[1], [0], [0], [1], [0, 0, 1, 1], [], []>} : vector<8x32xbf16>, vector<32x32xbf16>, vector<8x32xf32> -> vector<8x32xf32>
    %c0_12 = arith.constant 0 : index
    %c0_13 = arith.constant 0 : index
    %17 = vector.load %arg6[%c0_12, %c0_13] : memref<1x32xf32, #tpu.memory_space<vmem>>, vector<1x32xf32>
    %18 = vector.broadcast %17 : vector<1x32xf32> to vector<8x32xf32>
    %19 = arith.addf %16, %18 : vector<8x32xf32>
    %cst_14 = arith.constant dense<0.000000e+00> : vector<8xf32>
    %20 = vector.multi_reduction <add>, %0, %cst_14 [1] : vector<8x32xf32> to vector<8xf32>
    %21 = vector.shape_cast %20 : vector<8xf32> to vector<8x1xf32>
    %cst_15 = arith.constant 3.200000e+01 : f32
    %22 = vector.broadcast %cst_15 : f32 to vector<8x1xf32>
    %23 = arith.divf %21, %22 : vector<8x1xf32>
    %24 = vector.broadcast %23 : vector<8x1xf32> to vector<8x32xf32>
    %25 = arith.subf %0, %24 : vector<8x32xf32>
    %26 = arith.mulf %25, %25 : vector<8x32xf32>
    %cst_16 = arith.constant dense<0.000000e+00> : vector<8xf32>
    %27 = vector.multi_reduction <add>, %26, %cst_16 [1] : vector<8x32xf32> to vector<8xf32>
    %28 = vector.shape_cast %27 : vector<8xf32> to vector<8x1xf32>
    %cst_17 = arith.constant 3.200000e+01 : f32
    %29 = vector.broadcast %cst_17 : f32 to vector<8x1xf32>
    %30 = arith.divf %28, %29 : vector<8x1xf32>
    %31 = vector.broadcast %23 : vector<8x1xf32> to vector<8x32xf32>
    %32 = arith.subf %0, %31 : vector<8x32xf32>
    %cst_18 = arith.constant 9.99999997E-7 : f32
    %33 = vector.broadcast %cst_18 : f32 to vector<8x1xf32>
    %34 = arith.addf %30, %33 : vector<8x1xf32>
    %35 = math.rsqrt %34 : vector<8x1xf32>
    %36 = vector.broadcast %35 : vector<8x1xf32> to vector<8x32xf32>
    %37 = arith.mulf %32, %36 : vector<8x32xf32>
    %cst_19 = arith.constant 1.000000e+00 : f32
    %38 = vector.broadcast %cst_19 : f32 to vector<8x32xf32>
    %39 = arith.addf %38, %19 : vector<8x32xf32>
    %40 = arith.mulf %37, %39 : vector<8x32xf32>
    %41 = arith.addf %40, %14 : vector<8x32xf32>
    %42 = arith.truncf %41 : vector<8x32xf32> to vector<8x32xbf16>
    %c0_20 = arith.constant 0 : index
    %c0_21 = arith.constant 0 : index
    %43 = vector.load %arg7[%c0_20, %c0_21] : memref<32x128xbf16, #tpu.memory_space<vmem>>, vector<32x128xbf16>
    %cst_22 = arith.constant dense<0.000000e+00> : vector<8x128xf32>
    %44 = tpu.matmul %42, %43, %cst_22 {dimension_numbers = #tpu.dot_dimension_numbers<[1], [0], [0], [1], [0, 0, 1, 1], [], []>} : vector<8x32xbf16>, vector<32x128xbf16>, vector<8x128xf32> -> vector<8x128xf32>
    %c0_23 = arith.constant 0 : index
    %c0_24 = arith.constant 0 : index
    %45 = vector.load %arg8[%c0_23, %c0_24] : memref<1x128xf32, #tpu.memory_space<vmem>>, vector<1x128xf32>
    %46 = vector.broadcast %45 : vector<1x128xf32> to vector<8x128xf32>
    %47 = arith.addf %44, %46 : vector<8x128xf32>
    %c0_25 = arith.constant 0 : index
    %c0_26 = arith.constant 0 : index
    %48 = vector.load %arg9[%c0_25, %c0_26] : memref<8x128xf32, #tpu.memory_space<vmem>>, vector<8x128xf32>
    tpu.vector_store %arg9[%c0_25, %c0_26], %47 {strides = array<i32>} : memref<8x128xf32, #tpu.memory_space<vmem>>, vector<8x128xf32>,
    return
  }
  func.func @transform_0(%arg0: i32) -> (i32, i32) {
    %c0_i32 = arith.constant 0 : i32
    %c0_i32_0 = arith.constant 0 : i32
    return %arg0, %c0_i32 : i32, i32
  }
  func.func @transform_1(%arg0: i32) -> (i32, i32) {
    %c0_i32 = arith.constant 0 : i32
    %c0_i32_0 = arith.constant 0 : i32
    return %arg0, %c0_i32 : i32, i32
  }
  func.func @transform_2(%arg0: i32) -> (i32, i32) {
    %c0_i32 = arith.constant 0 : i32
    %c0_i32_0 = arith.constant 0 : i32
    %c0_i32_1 = arith.constant 0 : i32
    return %c0_i32, %c0_i32_0 : i32, i32
  }
  func.func @transform_3(%arg0: i32) -> (i32, i32) {
    %c0_i32 = arith.constant 0 : i32
    %c0_i32_0 = arith.constant 0 : i32
    %c0_i32_1 = arith.constant 0 : i32
    return %c0_i32, %c0_i32_0 : i32, i32
  }
  func.func @transform_4(%arg0: i32) -> (i32, i32) {
    %c0_i32 = arith.constant 0 : i32
    %c0_i32_0 = arith.constant 0 : i32
    %c0_i32_1 = arith.constant 0 : i32
    return %c0_i32, %c0_i32_0 : i32, i32
  }
  func.func @transform_5(%arg0: i32) -> (i32, i32) {
    %c0_i32 = arith.constant 0 : i32
    %c0_i32_0 = arith.constant 0 : i32
    %c0_i32_1 = arith.constant 0 : i32
    return %c0_i32, %c0_i32_0 : i32, i32
  }
  func.func @transform_6(%arg0: i32) -> (i32, i32) {
    %c0_i32 = arith.constant 0 : i32
    %c0_i32_0 = arith.constant 0 : i32
    %c0_i32_1 = arith.constant 0 : i32
    return %c0_i32, %c0_i32_0 : i32, i32
  }
  func.func @transform_7(%arg0: i32) -> (i32, i32) {
    %c0_i32 = arith.constant 0 : i32
    %c0_i32_0 = arith.constant 0 : i32
    %c0_i32_1 = arith.constant 0 : i32
    return %c0_i32, %c0_i32_0 : i32, i32
  }
  func.func @transform_8(%arg0: i32) -> (i32, i32) {
    %c0_i32 = arith.constant 0 : i32
    %c0_i32_0 = arith.constant 0 : i32
    return %arg0, %c0_i32 : i32, i32
  }
}

</mosaic_0001>

<bundles_post_ra>
// kernel: final_layer.1
= control target key start
LH: loop header
LB: loop body
LE: loop exit
PB: predicated region body
PF: predicated region fallthrough
CT: control target
= control target key end

     0   :  { %s1312_s0 = inlined_call_operand.hbm [shape: f32[16,32], index: 0, kind: input, shape index: {}]   ;;  %s1313_s1 = inlined_call_operand.hbm [shape: f32[16,32], index: 1, kind: input, shape index: {}]   ;;  %s1314_s2 = inlined_call_operand.hbm [shape: bf16[32,32], index: 2, kind: input, shape index: {}]   ;;  %s1315_s3 = inlined_call_operand.vmem [shape: bf16[32,32], index: 3, kind: input, shape index: {}]   ;;  %s1316_s4 = inlined_call_operand.vmem [shape: f32[1,32], index: 4, kind: input, shape index: {}]   ;;  %s1317_s5 = inlined_call_operand.vmem [shape: f32[1,32], index: 5, kind: input, shape index: {}]   ;;  %s1318_s6 = inlined_call_operand.hbm [shape: bf16[32,128], index: 6, kind: input, shape index: {}]   ;;  %s1319_s7 = inlined_call_operand.vmem [shape: f32[1,128], index: 7, kind: input, shape index: {}]   ;;  %s1320_s8 = inlined_call_operand.vmem [shape: f32[16,128], index: 8, kind: output, shape index: {}]  }
   0x1   :  { %1324 = sst [smem:[#allocation13_spill]] %s1314_s2 }
   0x2   :  { %1325 = sst [smem:[#allocation14_spill]] %s1318_s6 }
   0x3   :  { %13 = vsyncpa [#allocation3], 0 }
   0x4   :  { %15 = vsyncpa [#allocation3 + $0x1], 0 }
   0x5   :  { %16 = vsyncpa [#allocation5], 0 }
   0x6   :  { %18 = vsyncpa [#allocation5 + $0x1], 0 }
   0x7   :  { %19 = vsyncpa [#allocation8], 0  ;;  %s1079_s27 = smov 0   ;;  %s1081_s28 = smov 0  }
   0x8   :  { %s1083_s29 = smov 0   ;;  %s1085_s30 = smov 0  }
   0x9 LB: > { %s1098_s9 = sadd.s32 4294967295, %s1024_s30   ;;  %p45_p0 = scmp.ne.s32.totalorder %s1016_s28, %s1012_s27  ;;  %s1024_s30 = sphi %s1085_s30, %s1342_s30   ;;  %s1020_s29 = sphi %s1083_s29, %s1341_s29   ;;  %s1016_s28 = sphi %s1081_s28, %s1340_s28   ;;  %s1012_s27 = sphi %s1079_s27, %s1339_s27  }
   0xa   : > { %p1321_p1 = scmp.eq.s32.totalorder %s1098_s9, 0  ;;  %p720_p2 = scmp.ge.s32.totalorder %s1024_s30, 1 }
   0xb   : > { %p234_p3 = scmp.lt.s32.totalorder %s1024_s30, 3  ;;  %s1026_s12 = smov [#allocation6]  }
   0xc   : > { %p1106_p4 = por %p1321_p1, %p45_p0  ;;  %s246_s13 = sshll.u32 %s1026_s12, 4  ;;  %s247_s13 = int_to_ptr.vmem [resolvable:$true] %s246_s13 }
   0xd   : > { %p1110_p5 = pnand %p720_p2, %p234_p3  ;;  %s1027_s15 = smov [#allocation7]  }
   0xe   : > { %s1326_s10 = scalar_select %p1106_p4, 1, 0 }
   0xf   : > { %s1327_s11 = scalar_select %p1110_p5, 1, 0 }
  0x10   : > { %p793_p6 = pneg %p1110_p5  ;;  %s268_s16 = sshll.u32 %s1027_s15, 4  ;;  %s1122_s16 = int_to_ptr.vmem [resolvable:$true] %s268_s16 }
  0x11   : > { %s1329_s2 = sld [smem:[#allocation13_spill]] }
  0x12   : > { %p1118_p7 = pnand %p793_p6, %p1321_p1 }
  0x14   : > { %p864_p9 = pneg %p1118_p7 }
  0x17   : > { %s862_s19 = scalar_lea.hbm %s1329_s2, 256 }
  0x18   : > { %p863_p8 = scmp.ne.s32.totalorder %s1329_s2, %s862_s19  ;;  %p869_p12 = scmp.lt.u32.totalorder %s862_s19, %s1329_s2 }
  0x1a   : > { %p865_p10 = pnand %p864_p9, %p863_p8 }
  0x1c   : > { %p866_p11 = pneg %p865_p10 }
  0x1e   : > { %p871_p13 = pnand %p869_p12, %p866_p11 }
  0x20   : > { %874 = shalt.err (!%p871_p13)
}
  0x21   : > { %s875_s24 = scalar_lea.vmem %s247_s13, 256  ;;  %p883_p6 = scmp.lt.s32.totalorder %s247_s13, %s247_s13 }
  0x22   : > { %p876_p0 = scmp.ne.s32.totalorder %s247_s13, %s875_s24  ;;  %p884_p1 = scmp.lt.s32.totalorder %s875_s24, %s875_s24 }
  0x24   : > { %p878_p2 = pnand %p876_p0, %p864_p9  ;;  %p885_p4 = por %p884_p1, %p883_p6 }
  0x26   : > { %p879_p3 = pneg %p878_p2 }
  0x28   : > { %p886_p5 = pnand %p885_p4, %p879_p3 }
  0x2a   : > { %889 = shalt.err (!%p886_p5)
}
  0x2b   : > { %s1028_s25 = smov 64   ;;  %s1029_s26 = smov 4  }
  0x2c   : > { %796 = dma.hbm_to_vmem [thread:$0]  (!%p1118_p7), %s1329_s2, 256, %s247_s13, [#allocation5], %s1028_s25, %s1028_s25, %s1029_s26  }
  0x2d   : > { %s1330_s6 = sld [smem:[#allocation14_spill]] }
  0x33   : > { %s890_s18 = scalar_lea.hbm %s1330_s6, 256 }
  0x34   : > { %p891_p8 = scmp.ne.s32.totalorder %s1330_s6, %s890_s18  ;;  %p897_p5 = scmp.lt.u32.totalorder %s890_s18, %s1330_s6 }
  0x36   : > { %p893_p1 = pnand %p891_p8, %p864_p9 }
  0x38   : > { %p894_p4 = pneg %p893_p1 }
  0x3a   : > { %p899_p10 = pnand %p897_p5, %p894_p4 }
  0x3c   : > { %902 = shalt.err (!%p899_p10)
}
  0x3d   : > { %s903_s13 = scalar_lea.vmem %s1122_s16, 256  ;;  %p911_p0 = scmp.lt.s32.totalorder %s1122_s16, %s1122_s16 }
  0x3e   : > { %p904_p11 = scmp.ne.s32.totalorder %s1122_s16, %s903_s13  ;;  %p912_p2 = scmp.lt.s32.totalorder %s903_s13, %s903_s13 }
  0x40   : > { %p906_p12 = pnand %p904_p11, %p864_p9  ;;  %p913_p3 = por %p912_p2, %p911_p0 }
  0x42   : > { %p907_p13 = pneg %p906_p12 }
  0x44   : > { %p914_p6 = pnand %p913_p3, %p907_p13 }
  0x46   : > { %917 = shalt.err (!%p914_p6)
}
  0x47   : > { %799 = dma.hbm_to_vmem [thread:$0]  (!%p1118_p7), %s1330_s6, 256, %s1122_s16, [#allocation8], %s1028_s25, %s1028_s25, %s1029_s26  }
  0x48   : > { %s1172_s27 = sadd.s32 1, %s1024_s30   ;;  %s32_s12 = sadd.s32 1, %s1020_s29 }
  0x49   : > { %s29_s14 = ssub.s32 %s1024_s30, %s1172_s27  ;;  %p39_p9 = scmp.ne.s32.totalorder %s1020_s29, %s1016_s28 }
  0x4a   : > { %p30_p8 = scmp.eq.s32.totalorder %s29_s14, 0  ;;  %p40_p1 = scmp.eq.s32.totalorder %s1024_s30, 0 }
  0x4b   : > { %p809_p4 = scmp.lt.s32.totalorder %s1024_s30, 2  ;;  %s285_s15 = sand.u32 1, %s1020_s29  }
  0x4c   : > { %s1183_s17 = scalar_select %p30_p8, %s1020_s29, %s32_s12  }
  0x4d   : > { %p41_p5 = por %p40_p1, %p39_p9  ;;  %s1185_s18 = sshll.u32 %s285_s15, 3 }
  0x4e   : > { %s725_s19 = sshll.u32 %s1024_s30, 7  ;;  %s289_s25 = scalar_lea.vmem [#allocation2], %s1185_s18 }
  0x4f   : > { %s1191_s16 = scalar_lea.hbm %s1312_s0, %s725_s19  ;;  %s296_s26 = sshll.u32 %s289_s25, 4  ;;  %s1198_s26 = int_to_ptr.vmem [resolvable:$true] %s296_s26 }
  0x50   : > { %p1194_p7 = pnand %p809_p4, %p41_p5  ;;  %s1203_s24 = scalar_lea.hbm %s1313_s1, %s725_s19 }
  0x51   : > { %s286_s12 = scalar_lea.sflag [#allocation3], %s285_s15  ;;  %s918_s14 = scalar_lea.hbm %s1191_s16, 128 }
  0x52   : > { %p919_p10 = scmp.ne.s32.totalorder %s1191_s16, %s918_s14  ;;  %p920_p11 = pneg %p1194_p7 }
  0x53   : > { %s923_s25 = scalar_lea.hbm %s1312_s0, 256  ;;  %p924_p0 = scmp.lt.u32.totalorder %s1191_s16, %s1312_s0 }
  0x54   : > { %p921_p12 = pnand %p920_p11, %p919_p10  ;;  %p925_p2 = scmp.lt.u32.totalorder %s923_s25, %s918_s14 }
  0x55   : > { %p927_p6 = scmp.lt.u32.totalorder %s918_s14, %s1191_s16 }
  0x56   : > { %p922_p13 = pneg %p921_p12  ;;  %p926_p3 = por %p925_p2, %p924_p0 }
  0x58   : > { %p928_p9 = por %p927_p6, %p926_p3 }
  0x5a   : > { %p929_p8 = pnand %p928_p9, %p922_p13 }
  0x5c   : > { %932 = shalt.err (!%p929_p8)
}
  0x5d   : > { %s933_s15 = scalar_lea.vmem %s1198_s26, 128  ;;  %s1030_s19 = smov [#allocation2]  }
  0x5e   : > { %p934_p1 = scmp.ne.s32.totalorder %s1198_s26, %s933_s15  ;;  %s938_s13 = sshll.u32 %s1030_s19, 4  ;;  %s939_s13 = int_to_ptr.vmem [resolvable:$false] %s938_s13 }
  0x5f   : > { %s940_s2 = scalar_lea.vmem %s939_s13, 256  ;;  %p941_p10 = scmp.lt.s32.totalorder %s1198_s26, %s939_s13 }
  0x60   : > { %p936_p4 = pnand %p934_p1, %p920_p11  ;;  %p942_p12 = scmp.lt.s32.totalorder %s940_s2, %s933_s15 }
  0x62   : > { %p937_p5 = pneg %p936_p4  ;;  %p943_p0 = por %p942_p12, %p941_p10 }
  0x64   : > { %p944_p2 = pnand %p943_p0, %p937_p5 }
  0x66   : > { %947 = shalt.err (!%p944_p2)
}
  0x67   : > { %803 = dma.hbm_to_vmem [thread:$0]  (!%p1194_p7), %s1191_s16, 128, %s1198_s26, %s286_s12  }
  0x68   : > { %s303_s6 = sand.u32 1, %s1024_s30   ;;  %s307_s23 = scalar_lea.vmem [#allocation4], %s1185_s18 }
  0x69   : > { %s314_s14 = sshll.u32 %s307_s23, 4  ;;  %s304_s20 = scalar_lea.sflag [#allocation5], %s303_s6  ;;  %s315_s14 = int_to_ptr.vmem [resolvable:$true] %s314_s14 }
  0x6a   : > { %s948_s21 = scalar_lea.hbm %s1203_s24, 128  ;;  %s953_s19 = scalar_lea.hbm %s1313_s1, 256 }
  0x6b   : > { %p949_p13 = scmp.ne.s32.totalorder %s1203_s24, %s948_s21  ;;  %p954_p9 = scmp.lt.u32.totalorder %s1203_s24, %s1313_s1 }
  0x6c   : > { %p955_p8 = scmp.lt.u32.totalorder %s953_s19, %s948_s21  ;;  %p957_p4 = scmp.lt.u32.totalorder %s948_s21, %s1203_s24 }
  0x6d   : > { %p951_p3 = pnand %p949_p13, %p920_p11 }
  0x6e   : > { %p956_p1 = por %p955_p8, %p954_p9 }
  0x6f   : > { %p952_p6 = pneg %p951_p3 }
  0x70   : > { %p958_p5 = por %p957_p4, %p956_p1 }
  0x72   : > { %p959_p10 = pnand %p958_p5, %p952_p6 }
  0x74   : > { %962 = shalt.err (!%p959_p10)
}
  0x75   : > { %s963_s30 = scalar_lea.vmem %s315_s14, 128  ;;  %s1031_s18 = smov [#allocation4]  }
  0x76   : > { %p964_p12 = scmp.ne.s32.totalorder %s315_s14, %s963_s30  ;;  %s968_s16 = sshll.u32 %s1031_s18, 4  ;;  %s969_s16 = int_to_ptr.vmem [resolvable:$false] %s968_s16 }
  0x77   : > { %s970_s26 = scalar_lea.vmem %s969_s16, 256  ;;  %p971_p13 = scmp.lt.s32.totalorder %s315_s14, %s969_s16 }
  0x78   : > { %p966_p0 = pnand %p964_p12, %p920_p11  ;;  %p972_p3 = scmp.lt.s32.totalorder %s970_s26, %s963_s30 }
  0x7a   : > { %p967_p2 = pneg %p966_p0  ;;  %p973_p8 = por %p972_p3, %p971_p13 }
  0x7c   : > { %p974_p9 = pnand %p973_p8, %p967_p2 }
  0x7e   : > { %977 = shalt.err (!%p974_p9)
}
  0x7f   : > { %806 = dma.hbm_to_vmem [thread:$0]  (!%p1194_p7), %s1203_s24, 128, %s315_s14, %s304_s20  }
  0x80   : > { %p1332_p6 = scmp.ne.s32.totalorder %s1327_s11, 0 }
  0x81   : > { %s325_s12 = sand.u32 (!%p1332_p6), 1, %s1016_s28   ;;  %p1333_p11 = scmp.ne.s32.totalorder (!%p1332_p6), %s1326_s10, 0 }
  0x82   : > { %323 = sbr.rel (%p1332_p6) target bundleno = 680 (0x2a8), region = 52  ;;  %s729_s6 = sshll.u32 (!%p1332_p6), %s325_s12, 3 }
  0x83   : > { %s326_s23 = scalar_lea.sflag (!%p1332_p6), [#allocation3], %s325_s12  ;;  %s329_s21 = scalar_lea.vmem (!%p1332_p6), [#allocation2], %s729_s6 }
  0x89   : > { %995 = dma.done.wait (%p1333_p11), %s326_s23, 128  }
  0x8a   : > { %997 = vsyncadd (%p1333_p11), %s326_s23, 4294967168  ;;  %s334_s25 = sand.u32 1, %s1098_s9   ;;  %s338_s15 = scalar_lea.vmem [#allocation4], %s729_s6 }
  0x8b   : > { %s335_s22 = scalar_lea.sflag [#allocation5], %s334_s25 }
  0x8c   : > { %999 = dma.done.wait (%p1333_p11), %s335_s22, 128  }
  0x8d   : > { %1001 = vsyncadd (%p1333_p11), %s335_s22, 4294967168  ;;  %p1334_p7 = scmp.eq.s32.totalorder %s1098_s9, 0 }
  0x8f   : > { %1003 = dma.done.wait (%p1334_p7), [#allocation5], 256   ;;  %p1335_p1 = pmov %p1334_p7 }
  0x91   : > { %1005 = vsyncadd (%p1335_p1), [#allocation5], 4294967040  ;;  %p1336_p4 = pmov %p1335_p1 }
  0x92   : > { %p1337_p5 = pmov %p1335_p1 }
  0x93   : > { %1007 = dma.done.wait (%p1336_p4), [#allocation8], 256  }
  0x94   : > { %1009 = vsyncadd (%p1337_p5), [#allocation8], 4294967040  ;;  %v1032_v0 = vmov 0.0   ;;  %vm1033_vm0 = vmmov 0   ;;  %vm420_vm1 = vcmask 261120   ;;  %v388_v1 = vld [vmem:[%s329_s21] sm:$0xff] }
  0x95   : > { %765 = vmatprep.subr.bf16.mxu1 %v1032_v0  ;;  %757 = vmatprep.subr.bf16.mxu0 %v1032_v0  ;;  %v527_v2 = vsel %vm420_vm1, %v388_v1, 0.0  ;;  %v850_v3 = vld [vmem:[%s1315_s3] sm:$0xff]   ;;  %v852_v5 = vld [vmem:[%s1315_s3 + $0x8] sm:$0xff]   ;;  %v389_v6 = vld [vmem:[%s338_s15] sm:$0xff]  ;;  %p383_p10 = scmp.lt.s32.totalorder %s1098_s9, 1 }
  0x96   : > { %769 = vmatprep.mubr.msk.bf16.mxu1 %vm1033_vm0, %v1032_v0  ;;  %761 = vmatprep.mubr.msk.bf16.mxu0 %vm1033_vm0, %v1032_v0  ;;  %v851_v4 = vld [vmem:[#allocation6] sm:$0xff]   ;;  %v390_v7 = vsub.f32 0.0, %v389_v6  ;;  %v853_v8 = vld [vmem:[#allocation6 + $0x8] sm:$0xff]   ;;  %v854_v20 = vld [vmem:[#allocation7] sm:$0xff]  }
  0x97   : > { %528 = vadd.xlane.f32.xlu0 %v527_v2  ;;  %766 = vmatpush3.bf16.msra.mxu1 %v850_v3  ;;  %v855_v21 = vld [vmem:[#allocation7 + $0x8] sm:$0xff]   ;;  %v738_v33 = vld [vmem:[%s1317_s5] ss:$0 sm:$0xff]  ;;  %s1344_s9 = smov (!%p383_p10, %s1098_s9), 1 }
  0x98   : > { %767 = vmatprep.subr.bf16.mxu1 %v1032_v0  ;;  %758 = vmatpush3.bf16.msra.mxu0 %v851_v4  ;;  %v391_v9 = vmul.f32 1.442695, %v390_v7  ;;  %v734_v35 = vld [vmem:[%s1316_s4] ss:$0 sm:$0xff]  ;;  %s733_s30 = sshll.u32 %s1344_s9, 3 }
  0x99   : > { %759 = vmatprep.subr.bf16.mxu0 %v1032_v0  ;;  %v742_v43 = vld [vmem:[%s1319_s7] ss:$0 sm:$0xff]  ;;  %s386_s6 = scalar_lea.vmem %s1320_s8, %s733_s30 }
  0x9a   : > { %856 = vpow2.f32 %v391_v9 }
  0x9b   : > { %768 = vmatpush3.bf16.msra.mxu1 %v852_v5 }
  0x9c   : > { %760 = vmatpush3.bf16.msra.mxu0 %v853_v8 }
  0x9d   : > { %773 = vmatprep.subr.bf16.mxu0 %v1032_v0 }
  0xa4   : > { %v857_v10 = vpop.eup %856 }
  0xa5   : > { %v393_v11 = vadd.f32 1.0, %v857_v10 }
  0xa7   : > { %858 = vrcp.f32 %v393_v11 }
  0xb1   : > { %v859_v12 = vpop.eup %858 }
  0xb2   : > { %v395_v13 = vmul.f32 %v859_v12, %v389_v6 }
  0xb4   : > { %v396_v14 = vpack.c.bf16 %v395_v13, %v395_v13 }
  0xb6   : > { %770 = vmatmul.mubr.msk.bf16.vlgmr.msra.gmra.mrb[0].mxu1 %vm420_vm1, %v396_v14  ;;  %762 = vmatmul.mubr.msk.bf16.vlgmr.msra.gmra.mrb[0].mxu0 %vm420_vm1, %v396_v14 }
  0xb7   : > { %777 = vmatprep.mubr.msk.bf16.mxu0 %vm1033_vm0, %v1032_v0  ;;  %774 = vmatpush3.bf16.msra.mxu0 %v854_v20 }
  0xb8   : > { %775 = vmatprep.subr.bf16.mxu0 %v1032_v0 }
  0xbb   : > { %776 = vmatpush3.bf16.msra.mxu0 %v855_v21 }
 0x124   : > { %v529_v15 = vpop.xlane.xlu0 %528 }
 0x125   : > { %v531_v16 = vmul.f32 0.03125, %v529_v15 }
 0x127   : > { %v532_v17 = vsub.f32 %v388_v1, %v531_v16 }
 0x129   : > { %v533_v18 = vmul.f32 %v532_v17, %v532_v17 }
 0x12b   : > { %v534_v19 = vsel %vm420_vm1, %v533_v18, 0.0 }
 0x12c   : > { %535 = vadd.xlane.f32.xlu0 %v534_v19 }
 0x189   : > { %v521_v22 = vpop.f32.mrb[0].mxu1  ;;  %v458_v23 = vpop.f32.mrb[0].mxu0 }
 0x18a   : > { %v771_v24 = vpop.f32.mrb[1].mxu1  ;;  %v763_v25 = vpop.f32.mrb[1].mxu0  ;;  %v522_v34 = vadd.f32 %v738_v33, %v521_v22  ;;  %v459_v39 = vadd.f32 %v734_v35, %v458_v23 }
 0x18b   : > { %v524_v26 = vpop.f32.mrb[2].mxu1  ;;  %v461_v27 = vpop.f32.mrb[2].mxu0 }
 0x18c   : > { %v772_v28 = vpop.f32.mrb[3].mxu1  ;;  %v764_v29 = vpop.f32.mrb[3].mxu0  ;;  %v541_v36 = vadd.f32 1.0, %v522_v34 }
 0x1b9   : > { %v536_v30 = vpop.xlane.xlu0 %535 }
 0x1ba   : > { %v537_v31 = vmul.f32 0.03125, %v536_v30 }
 0x1bc   : > { %v538_v32 = vadd.f32 1e-06, %v537_v31 }
 0x1be   : > { %860 = vrsqrt.f32 %v538_v32 }
 0x1c8   : > { %v861_v37 = vpop.eup %860 }
 0x1c9   : > { %v540_v38 = vmul.f32 %v861_v37, %v532_v17 }
 0x1cb   : > { %v542_v40 = vmul.f32 %v541_v36, %v540_v38 }
 0x1cd   : > { %v543_v41 = vadd.f32 %v542_v40, %v459_v39 }
 0x1cf   : > { %v544_v42 = vpack.c.bf16 %v543_v41, %v543_v41 }
 0x1d1   : > { %778 = vmatmul.mubr.msk.bf16.vlgmr.msra.gmra.mrb[4].mxu0 %vm420_vm1, %v544_v42 }
 0x2a4   : > { %v605_v44 = vpop.f32.mrb[4].mxu0 }
 0x2a5   : > { %v606_v45 = vadd.f32 %v742_v43, %v605_v44  ;;  %v779_v46 = vpop.f32.mrb[5].mxu0 }
 0x2a6   : > { %v608_v47 = vpop.f32.mrb[6].mxu0 }
 0x2a7   : > { %611 = vst [vmem:[%s386_s6] sm:$0xff] %v606_v45  ;;  %v780_v48 = vpop.f32.mrb[7].mxu0 }
 0x2a8 PF: > { %s1338_s9 = smov %s1172_s27  ;;  %p22_p12 = scmp.ge.s32.totalorder %s1172_s27, 4  }
 0x2a9   : > { %s1339_s27 = smov %s1016_s28  ;;  %s1340_s28 = smov %s1020_s29 }
 0x2aa   : > { %s1341_s29 = smov %s1183_s17  ;;  %s1342_s30 = smov %s1338_s9 }
 0x2ab   :  { %24 = sbr.rel (!%p22_p12) target bundleno = 9 (0x9), region = 113 }
 0x2b2   :  { %631 = vsyncpa [#allocation3], 1 }
 0x2b3   :  { %633 = vsyncpa [#allocation3 + $0x1], 1 }
 0x2b4   :  { %634 = vsyncpa [#allocation5], 1 }
 0x2b5   :  { %636 = vsyncpa [#allocation5 + $0x1], 1 }
 0x2b6   :  { %637 = vsyncpa [#allocation8], 1 }

</bundles_post_ra>
